<compile_context>
chip_gen: v7x
topology: tpu7x:2x2x1
jax: 0.10.0
libtpu: 0.0.40
codegen_flags: <defaults>
</compile_context>

<pallas_src>
import functools
import math

import jax
import jax.numpy as jnp
from jax.experimental import pallas as pl
from jax.experimental.pallas import tpu as pltpu

# --------------------------------------------------------------------------
# Tiling configuration
# --------------------------------------------------------------------------
_TB_CAP = 512                      # batch tile cap (sublane axis)
_TC_CAP = 512                      # num_classes tile cap (lane axis, x256)
_TK_CAP = 2048                     # hidden-dim tile cap (reduction, x256)
_VMEM_LIMIT = 32 * 1024 * 1024     # scoped VMEM: safe on v5e/v6e/v7x


def _round_up(a: int, m: int) -> int:
    return (a + m - 1) // m * m


def _pick_lane_tile(dim: int, cap: int) -> int:
    """Lane-axis tile: whole (128-padded) dim if it fits under `cap`,
    otherwise a 256-multiple chosen to minimize padding, capped at `cap`."""
    d = _round_up(dim, 128)
    if d <= cap:
        return d
    n = math.ceil(d / cap)
    return min(cap, _round_up(math.ceil(d / n), 256))


# --------------------------------------------------------------------------
# Kernels
# --------------------------------------------------------------------------
def _head_kernel_single_k(x_ref, w_ref, b_ref, o_ref):
    # Whole reduction in one tile: no K grid axis, no accumulator scratch.
    o_ref[...] = (
        jnp.dot(x_ref[...], w_ref[...], preferred_element_type=jnp.float32)
        + b_ref[...]
    ).astype(o_ref.dtype)


def _head_kernel_acc_in_out(x_ref, w_ref, b_ref, o_ref):
    # f32 output block is resident across K (its index_map ignores k), so
    # accumulate directly into it: no scratch, no final copy pass.
    k = pl.program_id(2)

    @pl.when(k == 0)
    def _():
        o_ref[...] = jnp.zeros_like(o_ref)

    o_ref[...] += jnp.dot(
        x_ref[...], w_ref[...], preferred_element_type=jnp.float32
    )

    @pl.when(k == pl.num_programs(2) - 1)
    def _():
        o_ref[...] += b_ref[...]


def _head_kernel_scratch(x_ref, w_ref, b_ref, o_ref, acc_ref):
    # Non-f32 output: accumulate in f32 VMEM scratch, cast at the last K step.
    k = pl.program_id(2)

    @pl.when(k == 0)
    def _():
        acc_ref[...] = jnp.zeros_like(acc_ref)

    acc_ref[...] += jnp.dot(
        x_ref[...], w_ref[...], preferred_element_type=jnp.float32
    )

    @pl.when(k == pl.num_programs(2) - 1)
    def _():
        o_ref[...] = (acc_ref[...] + b_ref[...]).astype(o_ref.dtype)


# --------------------------------------------------------------------------
# One-time weight preparation (hoisted out of the per-call path)
# --------------------------------------------------------------------------
def prepare_head_params(weight, bias, *, compute_dtype=jnp.bfloat16,
                        tc_cap=_TC_CAP, tk_cap=_TK_CAP):
    """Transpose [C, H] -> [H, C], cast to the compute dtype, and zero-pad to
    lane-aligned tile multiples, so the forward path never transposes or pads
    the weight (saves a full weight-sized HBM round-trip per call)."""
    C, H = weight.shape
    tc = _pick_lane_tile(C, tc_cap)
    tk = _pick_lane_tile(H, tk_cap)
    Cp = _round_up(C, tc)
    Hp = _round_up(H, tk)
    wtp = jnp.pad(weight.T.astype(compute_dtype), ((0, Hp - H), (0, Cp - C)))
    bp = jnp.pad(bias.astype(jnp.float32), (0, Cp - C)).reshape(1, Cp)
    return {
        "wtp": wtp,
        "bp": bp,
        "num_classes": int(C),
        "hid_dim": int(H),
        "tc": int(tc),
        "tk": int(tk),
        "compute_dtype": compute_dtype,
    }


# --------------------------------------------------------------------------
# Forward
# --------------------------------------------------------------------------
@functools.partial(
    jax.jit,
    static_argnames=("num_classes", "hid_dim", "tc", "tk", "compute_dtype",
                     "tb_cap", "force_kernel"),
)
def classifier_head(x, wtp, bp, *, num_classes, hid_dim, tc, tk, compute_dtype,
                    tb_cap=_TB_CAP, force_kernel=False):
    """Pallas nn.Linear(hid_dim, num_classes): logits = x @ W^T + b.

    x: [B, H]; wtp: [Hp, Cp] pre-transposed+padded weight; bp: [1, Cp] f32 bias.
    """
    B, H = x.shape
    assert H == hid_dim, "feature dim mismatch"
    Hp, Cp = wtp.shape
    C = num_classes
    out_dtype = x.dtype

    # Tiny problems: pallas_call fixed overhead dominates -> plain XLA dot.
    if not force_kernel and (B * H * C) < 2_000_000:
        y = jnp.dot(x.astype(compute_dtype), wtp[:H, :],
                    preferred_element_type=jnp.float32) + bp[0]
        return y[:, :C].astype(out_dtype)

    # Batch tile: multiple of the packed sublane size (16 for bf16, 8 for f32)
    # and as large as possible (each extra B-tile re-reads the whole weight).
    sub = 16 if compute_dtype == jnp.bfloat16 else 8
    tb = min(tb_cap, _round_up(B, sub))
    Bp = _round_up(B, tb)

    # v7x megacore: ensure >= 2 parallel grid points when alignment allows.
    if (Bp // tb) * (Cp // tc) == 1:
        if tc >= 256:
            tc //= 2
        elif tb >= 2 * sub and (tb // 2) % sub == 0:
            tb //= 2

    xp = jnp.pad(x.astype(compute_dtype), ((0, Bp - B), (0, Hp - H)))

    n_b, n_c, n_k = Bp // tb, Cp // tc, Hp // tk
    in_itemsize = jnp.dtype(compute_dtype).itemsize
    cost = pl.CostEstimate(
        flops=2 * Bp * Hp * Cp,
        transcendentals=0,
        bytes_accessed=(Bp * Hp * in_itemsize              # activations
                        + n_b * Hp * Cp * in_itemsize      # weight, per B tile
                        + Bp * Cp * jnp.dtype(out_dtype).itemsize
                        + 4 * Cp),                         # bias
    )

    if n_k == 1:
        # Fast path: whole reduction in one tile (K axis dropped).
        out = pl.pallas_call(
            _head_kernel_single_k,
            out_shape=jax.ShapeDtypeStruct((Bp, Cp), out_dtype),
            grid_spec=pltpu.PrefetchScalarGridSpec(
                num_scalar_prefetch=0,
                grid=(n_b, n_c),
                in_specs=[
                    pl.BlockSpec((tb, Hp), lambda i, j: (i, 0)),
                    pl.BlockSpec((Hp, tc), lambda i, j: (0, j)),
                    pl.BlockSpec((1, tc), lambda i, j: (0, j)),
                ],
                out_specs=pl.BlockSpec((tb, tc), lambda i, j: (i, j)),
            ),
            compiler_params=pltpu.CompilerParams(
                dimension_semantics=("parallel", "parallel"),
                vmem_limit_bytes=_VMEM_LIMIT,
            ),
            cost_estimate=cost,
        )(xp, wtp, bp)
    else:
        in_specs = [
            pl.BlockSpec((tb, tk), lambda i, j, k: (i, k)),
            pl.BlockSpec((tk, tc), lambda i, j, k: (k, j)),
            # Bias ignores i and k -> stays resident, no re-DMA per step.
            pl.BlockSpec((1, tc), lambda i, j, k: (0, j)),
        ]
        out_spec = pl.BlockSpec((tb, tc), lambda i, j, k: (i, j))
        cparams = pltpu.CompilerParams(
            dimension_semantics=("parallel", "parallel", "arbitrary"),
            vmem_limit_bytes=_VMEM_LIMIT,
        )
        if out_dtype == jnp.float32:
            # Accumulate directly into the resident f32 output block.
            out = pl.pallas_call(
                _head_kernel_acc_in_out,
                out_shape=jax.ShapeDtypeStruct((Bp, Cp), jnp.float32),
                grid_spec=pltpu.PrefetchScalarGridSpec(
                    num_scalar_prefetch=0, grid=(n_b, n_c, n_k),
                    in_specs=in_specs, out_specs=out_spec),
                compiler_params=cparams,
                cost_estimate=cost,
            )(xp, wtp, bp)
        else:
            out = pl.pallas_call(
                _head_kernel_scratch,
                out_shape=jax.ShapeDtypeStruct((Bp, Cp), out_dtype),
                grid_spec=pltpu.PrefetchScalarGridSpec(
                    num_scalar_prefetch=0, grid=(n_b, n_c, n_k),
                    in_specs=in_specs, out_specs=out_spec,
                    scratch_shapes=[pltpu.VMEM((tb, tc), jnp.float32)]),
                compiler_params=cparams,
                cost_estimate=cost,
            )(xp, wtp, bp)

    # Slice off the lane-padding columns / batch-padding rows.
    return out[:B, :C]


def classifier_forward(x, head_params, **head_kwargs):
    """forward(x) = head(embedder(x))."""
    # TODO(synk): `init_embedder` is abstract (NotImplementedError) in the
    # reference Classifier, so the embedder is identity here; plug a concrete
    # embedder in front of this head kernel if one is defined.
    feats = x
    return classifier_head(
        feats,
        head_params["wtp"],
        head_params["bp"],
        num_classes=head_params["num_classes"],
        hid_dim=head_params["hid_dim"],
        tc=head_params["tc"],
        tk=head_params["tk"],
        compute_dtype=head_params["compute_dtype"],
        **head_kwargs,
    )


def init_params(key, hid_dim: int, num_classes: int) -> dict:
    """torch.nn.Linear default init: U[-1/sqrt(H), 1/sqrt(H)]."""
    kw, kb = jax.random.split(key)
    bound = 1.0 / jnp.sqrt(jnp.float32(hid_dim))
    head_w = jax.random.uniform(kw, (num_classes, hid_dim), jnp.float32, -bound, bound)
    head_b = jax.random.uniform(kb, (num_classes,), jnp.float32, -bound, bound)
    return {"head_w": head_w, "head_b": head_b}


if __name__ == "__main__":
    key = jax.random.PRNGKey(0)
    kx, kp, kx2, kp2 = jax.random.split(key, 4)

    # Small demo shapes (the head implied by the abstract module).
    batch, hid_dim, num_classes = 8, 32, 10
    x = jax.random.normal(kx, (batch, hid_dim), jnp.float32)
    params = init_params(kp, hid_dim, num_classes)
    ref = x @ params["head_w"].T + params["head_b"]

    # f32-operand path (tight tolerance).  force_kernel bypasses the
    # small-problem XLA fallback so the Pallas kernel is exercised.
    head_f32 = prepare_head_params(params["head_w"], params["head_b"],
                                   compute_dtype=jnp.float32)
    logits = jax.block_until_ready(classifier_forward(x, head_f32, force_kernel=True))
    assert logits.shape == (batch, num_classes)
    assert jnp.allclose(logits, ref, atol=1e-5, rtol=1e-5)

    # Default bf16-operand path (f32 accumulation), looser tolerance.
    head_bf16 = prepare_head_params(params["head_w"], params["head_b"])
    logits_bf16 = jax.block_until_ready(classifier_forward(x, head_bf16, force_kernel=True))
    assert logits_bf16.shape == (batch, num_classes)
    assert jnp.allclose(logits_bf16, ref, atol=5e-2, rtol=5e-2)

    # Exercise the multi-K-tile (resident-output accumulator) path once.
    batch2, hid2 = 16, 4096
    x2 = jax.random.normal(kx2, (batch2, hid2), jnp.float32)
    params2 = init_params(kp2, hid2, num_classes)
    ref2 = x2 @ params2["head_w"].T + params2["head_b"]
    head2 = prepare_head_params(params2["head_w"], params2["head_b"])
    logits2 = jax.block_until_ready(classifier_forward(x2, head2, force_kernel=True))
    assert logits2.shape == (batch2, num_classes)
    assert jnp.allclose(logits2, ref2, atol=5e-2, rtol=5e-2)

    print("KERNEL_OK")
</pallas_src>

<mosaic_0001>
module attributes {stable_mosaic.version = 11 : i64} {
  func.func @_head_kernel_single_k(%arg0: i32, %arg1: i32, %arg2: memref<8x128xf32, #tpu.memory_space<vmem>>, %arg3: memref<128x128xf32, #tpu.memory_space<vmem>>, %arg4: memref<1x128xf32, #tpu.memory_space<vmem>>, %arg5: memref<8x128xf32, #tpu.memory_space<vmem>>) attributes {dimension_semantics = [#tpu.dimension_semantics<parallel>, #tpu.dimension_semantics<parallel>], iteration_bounds = array<i64: 1, 1>, scalar_prefetch = 0 : i64, scratch_operands = 0 : i64, tpu.core_type = #tpu.core_type<tc>, window_params = [{transform_indices = @transform_0, window_bounds = array<i64: 8, 128>}, {transform_indices = @transform_1, window_bounds = array<i64: 128, 128>}, {transform_indices = @transform_2, window_bounds = array<i64: 1, 128>}, {transform_indices = @transform_3, window_bounds = array<i64: 8, 128>}]} {
    %c0 = arith.constant 0 : index
    %c0_0 = arith.constant 0 : index
    %0 = vector.load %arg2[%c0, %c0_0] : memref<8x128xf32, #tpu.memory_space<vmem>>, vector<8x128xf32>
    %c0_1 = arith.constant 0 : index
    %c0_2 = arith.constant 0 : index
    %1 = vector.load %arg3[%c0_1, %c0_2] : memref<128x128xf32, #tpu.memory_space<vmem>>, vector<128x128xf32>
    %cst = arith.constant dense<0.000000e+00> : vector<8x128xf32>
    %2 = tpu.matmul %0, %1, %cst {dimension_numbers = #tpu.dot_dimension_numbers<[1], [0], [0], [1], [0, 0, 1, 1], [], []>} : vector<8x128xf32>, vector<128x128xf32>, vector<8x128xf32> -> vector<8x128xf32>
    %c0_3 = arith.constant 0 : index
    %c0_4 = arith.constant 0 : index
    %3 = vector.load %arg4[%c0_3, %c0_4] : memref<1x128xf32, #tpu.memory_space<vmem>>, vector<1x128xf32>
    %4 = vector.broadcast %3 : vector<1x128xf32> to vector<8x128xf32>
    %5 = arith.addf %2, %4 : vector<8x128xf32>
    %c0_5 = arith.constant 0 : index
    %c0_6 = arith.constant 0 : index
    %6 = vector.load %arg5[%c0_5, %c0_6] : memref<8x128xf32, #tpu.memory_space<vmem>>, vector<8x128xf32>
    tpu.vector_store %arg5[%c0_5, %c0_6], %5 {strides = array<i32>} : memref<8x128xf32, #tpu.memory_space<vmem>>, vector<8x128xf32>,
    return
  }
  func.func @transform_0(%arg0: i32, %arg1: i32) -> (i32, i32) {
    %c0_i32 = arith.constant 0 : i32
    %c0_i32_0 = arith.constant 0 : i32
    return %arg0, %c0_i32 : i32, i32
  }
  func.func @transform_1(%arg0: i32, %arg1: i32) -> (i32, i32) {
    %c0_i32 = arith.constant 0 : i32
    %c0_i32_0 = arith.constant 0 : i32
    return %c0_i32, %arg1 : i32, i32
  }
  func.func @transform_2(%arg0: i32, %arg1: i32) -> (i32, i32) {
    %c0_i32 = arith.constant 0 : i32
    %c0_i32_0 = arith.constant 0 : i32
    return %c0_i32, %arg1 : i32, i32
  }
  func.func @transform_3(%arg0: i32, %arg1: i32) -> (i32, i32) {
    %c0_i32 = arith.constant 0 : i32
    return %arg0, %arg1 : i32, i32
  }
}

</mosaic_0001>

<bundles_post_ra>
// kernel: classifier_head.1
= control target key start
LH: loop header
LB: loop body
LE: loop exit
PB: predicated region body
PF: predicated region fallthrough
CT: control target
= control target key end

     0   :  { %8 = vsyncpa [#allocation3], 0  ;;  %s328_s0 = inlined_call_operand.vmem [shape: f32[8,128], index: 0, kind: input, shape index: {}]   ;;  %s329_s1 = inlined_call_operand.hbm [shape: f32[128,128], index: 1, kind: input, shape index: {}]   ;;  %s330_s2 = inlined_call_operand.vmem [shape: f32[1,128], index: 2, kind: input, shape index: {}]   ;;  %s331_s3 = inlined_call_operand.hbm [shape: f32[8,128], index: 3, kind: output, shape index: {}]  }
   0x1   :  { %9 = vsyncpa [#allocation4], 0  ;;  %s271_s12 = smov [#allocation2]   ;;  %s223_s16 = scalar_lea.hbm %s329_s1, 2048 }
   0x2   :  { %s17_s13 = sshll.u32 %s271_s12, 4  ;;  %p224_p0 = scmp.ne.s32.totalorder %s329_s1, %s223_s16  ;;  %s18_s13 = int_to_ptr.vmem [resolvable:$true] %s17_s13 }
   0x3   :  { %p227_p1 = scmp.lt.u32.totalorder %s223_s16, %s329_s1 }
   0x5   :  { %p229_p2 = pnand %p227_p1, %p224_p0 }
   0x7   :  { %232 = shalt.err (!%p229_p2)
}
   0x8   :  { %s233_s21 = scalar_lea.vmem %s18_s13, 2048  ;;  %p238_p4 = scmp.lt.s32.totalorder %s18_s13, %s18_s13 }
   0x9   :  { %p234_p3 = scmp.ne.s32.totalorder %s18_s13, %s233_s21  ;;  %p239_p5 = scmp.lt.s32.totalorder %s233_s21, %s233_s21 }
   0xb   :  { %p240_p6 = por %p239_p5, %p238_p4 }
   0xd   :  { %p241_p7 = pnand %p240_p6, %p234_p3 }
   0xf   :  { %244 = shalt.err (!%p241_p7)
}
  0x10   :  { %s272_s22 = smov 128   ;;  %s273_s23 = smov 8  }
  0x11   :  { %23 = dma.hbm_to_vmem [thread:$0]  %s329_s1, 2048, %s18_s13, [#allocation3], %s272_s22, %s272_s22, %s273_s23  }
  0x12   :  { %267 = dma.done.wait [#allocation3], 2048  }
  0x13   :  { %268 = vsyncadd [#allocation3], 4294965248  ;;  %v274_v0 = vmov 0.0|0.0   ;;  %vm275_vm0 = vmmov 0   ;;  %v276_v1 = vmov 0.0   ;;  %v30_v2 = vld [vmem:[#allocation2] sm:$0xff] }
  0x14   :  { %192 = vmatprep.subr.bf16.mxu0 %v274_v0  ;;  %189 = vmatprep.mubr.msk.f32.mxu0 %vm275_vm0, %v276_v1  ;;  %v31_v3 = vld [vmem:[#allocation2 + $0x8] sm:$0xff]  ;;  %v32_v4 = vld [vmem:[#allocation2 + $0x10] sm:$0xff]  ;;  %v33_v6 = vld [vmem:[#allocation2 + $0x18] sm:$0xff]  ;;  %s277_s29 = smov [#allocation5]  }
  0x15   :  { %v193_v5 = vpack.c.bf16 %v31_v3, %v30_v2  ;;  %v196_v7 = vpack.c.bf16 %v33_v6, %v32_v4  ;;  %v34_v8 = vld [vmem:[#allocation2 + $0x20] sm:$0xff]  ;;  %v35_v9 = vld [vmem:[#allocation2 + $0x28] sm:$0xff]  ;;  %v36_v11 = vld [vmem:[#allocation2 + $0x30] sm:$0xff]  ;;  %s130_s30 = sshll.u32 %s277_s29, 4  ;;  %s131_s30 = int_to_ptr.vmem [resolvable:$true] %s130_s30 }
  0x16   :  { %v199_v10 = vpack.c.bf16 %v35_v9, %v34_v8  ;;  %v37_v12 = vld [vmem:[#allocation2 + $0x38] sm:$0xff]  ;;  %v38_v14 = vld [vmem:[#allocation2 + $0x40] sm:$0xff]  ;;  %v39_v15 = vld [vmem:[#allocation2 + $0x48] sm:$0xff]  ;;  %s245_s4 = scalar_lea.vmem %s131_s30, 128  ;;  %p250_p9 = scmp.lt.s32.totalorder %s131_s30, %s131_s30 }
  0x17   :  { %194 = vmatpush3.bf16.msra.mxu0 %v193_v5  ;;  %v202_v13 = vpack.c.bf16 %v37_v12, %v36_v11  ;;  %v205_v16 = vpack.c.bf16 %v39_v15, %v38_v14  ;;  %v40_v17 = vld [vmem:[#allocation2 + $0x50] sm:$0xff]  ;;  %v41_v18 = vld [vmem:[#allocation2 + $0x58] sm:$0xff]  ;;  %v42_v20 = vld [vmem:[#allocation2 + $0x60] sm:$0xff]  ;;  %p246_p8 = scmp.ne.s32.totalorder %s131_s30, %s245_s4  ;;  %p251_p10 = scmp.lt.s32.totalorder %s245_s4, %s245_s4 }
  0x18   :  { %195 = vmatprep.subr.bf16.mxu0 %v274_v0  ;;  %v208_v19 = vpack.c.bf16 %v41_v18, %v40_v17  ;;  %v43_v21 = vld [vmem:[#allocation2 + $0x68] sm:$0xff]  ;;  %v44_v23 = vld [vmem:[#allocation2 + $0x70] sm:$0xff]  ;;  %v45_v24 = vld [vmem:[#allocation2 + $0x78] sm:$0xff] }
  0x19   :  { %v211_v22 = vpack.c.bf16 %v43_v21, %v42_v20  ;;  %v214_v25 = vpack.c.bf16 %v45_v24, %v44_v23  ;;  %v29_v26 = vld [vmem:[%s328_s0] sm:$0xff]  ;;  %p252_p11 = por %p251_p10, %p250_p9 }
  0x1a   :  { %v139_v27 = vld [vmem:[%s330_s2] ss:$0 sm:$0xff] }
  0x1b   :  { %197 = vmatpush3.bf16.msra.mxu0 %v196_v7  ;;  %p253_p12 = pnand %p252_p11, %p246_p8 }
  0x1c   :  { %198 = vmatprep.subr.bf16.mxu0 %v274_v0 }
  0x1f   :  { %200 = vmatpush3.bf16.msra.mxu0 %v199_v10 }
  0x20   :  { %201 = vmatprep.subr.bf16.mxu0 %v274_v0 }
  0x23   :  { %203 = vmatpush3.bf16.msra.mxu0 %v202_v13 }
  0x24   :  { %204 = vmatprep.subr.bf16.mxu0 %v274_v0 }
  0x27   :  { %206 = vmatpush3.bf16.msra.mxu0 %v205_v16 }
  0x28   :  { %207 = vmatprep.subr.bf16.mxu0 %v274_v0 }
  0x2b   :  { %209 = vmatpush3.bf16.msra.mxu0 %v208_v19 }
  0x2c   :  { %210 = vmatprep.subr.bf16.mxu0 %v274_v0 }
  0x2f   :  { %212 = vmatpush3.bf16.msra.mxu0 %v211_v22 }
  0x30   :  { %213 = vmatprep.subr.bf16.mxu0 %v274_v0 }
  0x33   :  { %215 = vmatpush3.bf16.msra.mxu0 %v214_v25 }
  0x36   :  { %190 = vmatmul.mubr.f32.vlgmr.msra.gmra.mrb[0].mxu0 %v29_v26 }
 0x109   :  { %v119_v28 = vpop.f32.mrb[0].mxu0 }
 0x10a   :  { %v120_v29 = vadd.f32 %v139_v27, %v119_v28  ;;  %v191_v30 = vpop.f32.mrb[1].mxu0 }
 0x10c   :  { %123 = vst [vmem:[#allocation5] sm:$0xff] %v120_v29 }
 0x10d   :  { %256 = shalt.err (!%p253_p12)
}
 0x10e   :  { %s257_s6 = scalar_lea.hbm %s331_s3, 128 }
 0x10f   :  { %p258_p13 = scmp.ne.s32.totalorder %s331_s3, %s257_s6  ;;  %p261_p0 = scmp.lt.u32.totalorder %s257_s6, %s331_s3 }
 0x111   :  { %p263_p1 = pnand %p261_p0, %p258_p13 }
 0x113   :  { %266 = shalt.err (!%p263_p1)
}
 0x114   :  { %133 = dma.vmem_to_hbm [thread:$0]  %s131_s30, 128, %s331_s3, [#allocation4]  }
 0x115   :  { %269 = dma.done.wait [#allocation4], 128  }
 0x116   :  { %270 = vsyncadd [#allocation4], 4294967168 }
 0x117   :  { %137 = vsyncpa [#allocation3], 1 }
 0x118   :  { %138 = vsyncpa [#allocation4], 1 }

</bundles_post_ra>
